<compile_context>
chip_gen: v7x
topology: tpu7x:2x2x1
jax: 0.10.0
libtpu: 0.0.40
codegen_flags: <defaults>
</compile_context>

<pallas_src>
import numpy as np
import jax
import jax.numpy as jnp
from jax import lax
from jax.experimental import pallas as pl
from jax.experimental.pallas import tpu as pltpu


# ----------------------------------------------------------------------------
# Pallas kernel: 1x1 conv projection == row-tiled matmul + bias
# ----------------------------------------------------------------------------
def _proj_kernel(x_ref, w_ref, b_ref, o_ref):
    # x_ref: (TN, C) bf16   w_ref: (C, Ep) bf16   b_ref: (1, Ep) f32
    # o_ref: (TN, Ep) out_dtype
    acc = jnp.dot(x_ref[...], w_ref[...],
                  preferred_element_type=jnp.float32)   # MXU, f32 accumulation
    acc = acc + b_ref[...]                              # f32 bias add (VPU)
    o_ref[...] = acc.astype(o_ref.dtype)


def _vmem_need_bytes(tn, c, e_pad, in_bytes, out_bytes):
    # Double-buffered x and out tiles + (constant-index, still 2-buffered)
    # weight and bias blocks.
    return (2 * tn * c * in_bytes
            + 2 * c * e_pad * in_bytes
            + 2 * e_pad * 4
            + 2 * tn * e_pad * out_bytes)


def _choose_row_tile(rows, c, e_pad, in_bytes, out_bytes,
                     budget_bytes=24 * 1024 * 1024):
    """Largest lane/sublane-friendly row tile whose working set fits the VMEM
    budget (sized for v7x's 64 MiB per-TC VMEM; also fine on v5e/v6e)."""
    for tn in (2048, 1024, 512, 256, 128):
        if rows % tn:
            continue
        if _vmem_need_bytes(tn, c, e_pad, in_bytes, out_bytes) <= budget_bytes:
            return tn
    # Small problem (or rows not a multiple of 128): one full block.
    return rows


# ----------------------------------------------------------------------------
# Wrapper: proj(feat).flatten(2).transpose(1, 2)
# ----------------------------------------------------------------------------
def hybrid_embed_proj(feat_bhwc, w_ec, b_e, *, matmul_dtype=jnp.bfloat16,
                      out_dtype=None):
    """feat_bhwc: (B, Hf, Wf, C) feature map (NHWC layout).
    w_ec: (E, C)  -- nn.Conv2d(feature_dim, embed_dim, 1).weight squeezed.
    b_e:  (E,).
    Returns (B, Hf*Wf, E), matching `proj(x).flatten(2).transpose(1, 2)`."""
    B, Hf, Wf, C = feat_bhwc.shape
    E = w_ec.shape[0]
    N = Hf * Wf
    rows = B * N
    if out_dtype is None:
        out_dtype = feat_bhwc.dtype

    # Lane-dense output: pad E up to a multiple of 128 so stores are unmasked.
    Ep = max(128, ((E + 127) // 128) * 128)

    # Free row-major collapse (no transpose): (B, Hf, Wf, C) -> (B*N, C).
    # The bf16 cast fuses into the backbone epilogue under jit, so only the
    # half-width feature map hits HBM on the kernel's read path.
    x_rows = feat_bhwc.reshape(rows, C).astype(matmul_dtype)

    w_ce = jnp.transpose(w_ec, (1, 0)).astype(matmul_dtype)      # (C, E) tiny
    b_1e = b_e.reshape(1, E).astype(jnp.float32)
    if Ep != E:
        w_ce = jnp.pad(w_ce, ((0, 0), (0, Ep - E)))
        b_1e = jnp.pad(b_1e, ((0, 0), (0, Ep - E)))

    in_bytes = np.dtype(matmul_dtype).itemsize
    out_bytes = np.dtype(out_dtype).itemsize
    tn = _choose_row_tile(rows, C, Ep, in_bytes, out_bytes)
    need = _vmem_need_bytes(tn, C, Ep, in_bytes, out_bytes)
    vmem_limit = int(min(max(2 * need, 8 * 1024 * 1024), 32 * 1024 * 1024))

    cost = pl.CostEstimate(
        flops=2 * rows * C * Ep,
        transcendentals=0,
        bytes_accessed=(rows * C * in_bytes + C * Ep * in_bytes
                        + Ep * 4 + rows * Ep * out_bytes),
    )

    out = pl.pallas_call(
        _proj_kernel,
        out_shape=jax.ShapeDtypeStruct((rows, Ep), out_dtype),
        grid_spec=pltpu.PrefetchScalarGridSpec(
            num_scalar_prefetch=0,
            grid=(rows // tn,),
            in_specs=[
                pl.BlockSpec((tn, C), lambda r: (r, 0)),
                # Constant index maps: weight/bias DMA'd once, stay resident.
                pl.BlockSpec((C, Ep), lambda r: (0, 0)),
                pl.BlockSpec((1, Ep), lambda r: (0, 0)),
            ],
            out_specs=pl.BlockSpec((tn, Ep), lambda r: (r, 0)),
        ),
        compiler_params=pltpu.CompilerParams(
            # Independent row tiles -> both TensorCores get work on v7x.
            dimension_semantics=("parallel",),
            vmem_limit_bytes=vmem_limit,
        ),
        cost_estimate=cost,
    )(x_rows, w_ce, b_1e)

    if Ep != E:
        out = out[:, :E]
    return out.reshape(B, N, E)


# ----------------------------------------------------------------------------
# Synthetic CNN backbone (plain JAX glue).
# TODO(synk): the real module wraps an arbitrary nn.Module backbone; here we use
# a deterministic stride-2 3x3 conv + bias + ReLU as a stand-in, emitting the
# feature map directly in NHWC so no layout transpose is ever needed downstream.
# ----------------------------------------------------------------------------
def backbone_forward(x_nchw, conv_w, conv_b):
    # x_nchw: (B, Cin, H, W); conv_w: (Cout, Cin, 3, 3); conv_b: (Cout,)
    y = lax.conv_general_dilated(
        x_nchw, conv_w,
        window_strides=(2, 2),
        padding=((1, 1), (1, 1)),
        dimension_numbers=("NCHW", "OIHW", "NHWC"),
    )
    y = y + conv_b.reshape(1, 1, 1, -1)
    return jnp.maximum(y, 0.0)                     # (B, Hf, Wf, Cout)


@jax.jit
def hybrid_embed_forward(x, params):
    feat = backbone_forward(x, params["bb_w"], params["bb_b"])
    return hybrid_embed_proj(feat, params["proj_w"], params["proj_b"],
                             matmul_dtype=jnp.bfloat16, out_dtype=x.dtype)


# ----------------------------------------------------------------------------
if __name__ == "__main__":
    # small shapes: batch=2, in_chans=4, img=16x16, feature_dim=32, embed_dim=64
    B, Cin, H, W = 2, 4, 16, 16
    feature_dim, embed_dim = 32, 64

    key = jax.random.PRNGKey(0)
    k_x, k_bw, k_bb, k_pw, k_pb = jax.random.split(key, 5)

    x = jax.random.normal(k_x, (B, Cin, H, W), dtype=jnp.float32)
    params = {
        "bb_w": 0.1 * jax.random.normal(k_bw, (feature_dim, Cin, 3, 3), jnp.float32),
        "bb_b": 0.1 * jax.random.normal(k_bb, (feature_dim,), jnp.float32),
        # nn.Conv2d(feature_dim, embed_dim, 1).weight has shape (E, C, 1, 1);
        # stored squeezed as (E, C).
        "proj_w": 0.1 * jax.random.normal(k_pw, (embed_dim, feature_dim), jnp.float32),
        "proj_b": 0.1 * jax.random.normal(k_pb, (embed_dim,), jnp.float32),
    }

    out = hybrid_embed_forward(x, params)
    out = jax.block_until_ready(out)

    # Reference: pure-f32 JAX backbone + 1x1 conv projection,
    # i.e. proj(feat).flatten(2).transpose(1, 2).  The kernel runs its matmul
    # in bf16 with f32 accumulation, so compare with a bf16-level tolerance.
    feat_ref = backbone_forward(x, params["bb_w"], params["bb_b"])   # (B,Hf,Wf,C) f32
    ref = jnp.einsum("bhwc,ec->bhwe", feat_ref, params["proj_w"]) \
        + params["proj_b"].reshape(1, 1, 1, -1)
    Hf, Wf = H // 2, W // 2
    ref = ref.reshape(B, Hf * Wf, embed_dim)

    assert out.shape == (B, Hf * Wf, embed_dim), out.shape
    assert out.dtype == x.dtype, out.dtype
    err = float(jnp.max(jnp.abs(out - ref)))
    assert jnp.allclose(out, ref, atol=2e-2, rtol=2e-2), err
    print("KERNEL_OK")
</pallas_src>

<mosaic_0001>
module attributes {stable_mosaic.version = 11 : i64} {
  func.func @_proj_kernel(%arg0: i32, %arg1: memref<128x32xbf16, #tpu.memory_space<vmem>>, %arg2: memref<32x128xbf16, #tpu.memory_space<vmem>>, %arg3: memref<1x128xf32, #tpu.memory_space<vmem>>, %arg4: memref<128x128xf32, #tpu.memory_space<vmem>>) attributes {dimension_semantics = [#tpu.dimension_semantics<parallel>], iteration_bounds = array<i64: 1>, scalar_prefetch = 0 : i64, scratch_operands = 0 : i64, tpu.core_type = #tpu.core_type<tc>, window_params = [{transform_indices = @transform_0, window_bounds = array<i64: 128, 32>}, {pipeline_mode = #tpu.pipeline_mode<synchronous>, transform_indices = @transform_1, window_bounds = array<i64: 32, 128>}, {pipeline_mode = #tpu.pipeline_mode<synchronous>, transform_indices = @transform_2, window_bounds = array<i64: 1, 128>}, {transform_indices = @transform_3, window_bounds = array<i64: 128, 128>}]} {
    %c0 = arith.constant 0 : index
    %c0_0 = arith.constant 0 : index
    %0 = vector.load %arg1[%c0, %c0_0] : memref<128x32xbf16, #tpu.memory_space<vmem>>, vector<128x32xbf16>
    %c0_1 = arith.constant 0 : index
    %c0_2 = arith.constant 0 : index
    %1 = vector.load %arg2[%c0_1, %c0_2] : memref<32x128xbf16, #tpu.memory_space<vmem>>, vector<32x128xbf16>
    %cst = arith.constant dense<0.000000e+00> : vector<128x128xf32>
    %2 = tpu.matmul %0, %1, %cst {dimension_numbers = #tpu.dot_dimension_numbers<[1], [0], [0], [1], [0, 0, 1, 1], [], []>} : vector<128x32xbf16>, vector<32x128xbf16>, vector<128x128xf32> -> vector<128x128xf32>
    %c0_3 = arith.constant 0 : index
    %c0_4 = arith.constant 0 : index
    %3 = vector.load %arg3[%c0_3, %c0_4] : memref<1x128xf32, #tpu.memory_space<vmem>>, vector<1x128xf32>
    %4 = vector.broadcast %3 : vector<1x128xf32> to vector<128x128xf32>
    %5 = arith.addf %2, %4 : vector<128x128xf32>
    %c0_5 = arith.constant 0 : index
    %c0_6 = arith.constant 0 : index
    %6 = vector.load %arg4[%c0_5, %c0_6] : memref<128x128xf32, #tpu.memory_space<vmem>>, vector<128x128xf32>
    tpu.vector_store %arg4[%c0_5, %c0_6], %5 {strides = array<i32>} : memref<128x128xf32, #tpu.memory_space<vmem>>, vector<128x128xf32>,
    return
  }
  func.func @transform_0(%arg0: i32) -> (i32, i32) {
    %c0_i32 = arith.constant 0 : i32
    %c0_i32_0 = arith.constant 0 : i32
    return %arg0, %c0_i32 : i32, i32
  }
  func.func @transform_1(%arg0: i32) -> (i32, i32) {
    %c0_i32 = arith.constant 0 : i32
    %c0_i32_0 = arith.constant 0 : i32
    %c0_i32_1 = arith.constant 0 : i32
    return %c0_i32, %c0_i32_0 : i32, i32
  }
  func.func @transform_2(%arg0: i32) -> (i32, i32) {
    %c0_i32 = arith.constant 0 : i32
    %c0_i32_0 = arith.constant 0 : i32
    %c0_i32_1 = arith.constant 0 : i32
    return %c0_i32, %c0_i32_0 : i32, i32
  }
  func.func @transform_3(%arg0: i32) -> (i32, i32) {
    %c0_i32 = arith.constant 0 : i32
    %c0_i32_0 = arith.constant 0 : i32
    return %arg0, %c0_i32 : i32, i32
  }
}

</mosaic_0001>

<bundles_post_ra>
// kernel: hybrid_embed_forward.1
= control target key start
LH: loop header
LB: loop body
LE: loop exit
PB: predicated region body
PF: predicated region fallthrough
CT: control target
= control target key end

     0   :  { %vm95_vm0 = vcmask 261120   ;;  %s415_s0 = inlined_call_operand.vmem [shape: bf16[128,32], index: 0, kind: input, shape index: {}]   ;;  %s416_s1 = inlined_call_operand.vmem [shape: bf16[32,128], index: 1, kind: input, shape index: {}]   ;;  %s417_s2 = inlined_call_operand.vmem [shape: f32[1,128], index: 2, kind: input, shape index: {}]   ;;  %s418_s3 = inlined_call_operand.hbm [shape: f32[128,128], index: 3, kind: output, shape index: {}]  }
   0x1   :  { %v305_v0 = vld [vmem:[%s416_s1] sm:$0xff]   ;;  %v306_v1 = vld [vmem:[%s416_s1 + $0x8] sm:$0xff]   ;;  %v311_v6 = vld [vmem:[%s415_s0 + $0x10] sm:$0xff]  }
   0x2   :  { %278 = vmatprep.subr.bf16.mxu0 %v305_v0  ;;  %298 = vmatprep.subr.bf16.mxu1 %v305_v0  ;;  %v307_v2 = vld [vmem:[%s415_s0] sm:$0xff]   ;;  %v309_v4 = vld [vmem:[%s415_s0 + $0x8] sm:$0xff]   ;;  %v312_v7 = vld [vmem:[%s415_s0 + $0x30] sm:$0xff]  }
   0x3   :  { %279 = vmatpush3.bf16.msra.mxu0 %v305_v0  ;;  %300 = vmatpush3.bf16.msra.mxu1 %v305_v0  ;;  %v308_v3 = vld [vmem:[%s415_s0 + $0x20] sm:$0xff]   ;;  %v310_v5 = vld [vmem:[%s415_s0 + $0x28] sm:$0xff]  }
   0x4   :  { %280 = vmatprep.subr.bf16.mxu0 %v306_v1  ;;  %299 = vmatprep.subr.bf16.mxu1 %v306_v1 }
   0x5   :  { %282 = vmatprep.mubr.msk.bf16.mxu0 %vm95_vm0, %v307_v2  ;;  %290 = vmatprep.mubr.msk.bf16.mxu1 %vm95_vm0, %v308_v3 }
   0x7   :  { %281 = vmatpush3.bf16.msra.mxu0 %v306_v1  ;;  %301 = vmatpush3.bf16.msra.mxu1 %v306_v1 }
   0xa   :  { %283 = vmatmul.mubr.msk.bf16.vlgmr.msra.gmra.mrb[0].mxu0 %vm95_vm0, %v309_v4  ;;  %291 = vmatmul.mubr.msk.bf16.vlgmr.msra.gmra.mrb[0].mxu1 %vm95_vm0, %v310_v5 }
   0xb   :  { %8 = vsyncpa [#allocation3], 0  ;;  %286 = vmatprep.mubr.msk.bf16.mxu0 %vm95_vm0, %v311_v6  ;;  %294 = vmatprep.mubr.msk.bf16.mxu1 %vm95_vm0, %v312_v7  ;;  %v313_v8 = vld [vmem:[%s415_s0 + $0x18] sm:$0xff]   ;;  %v249_v10 = vld [vmem:[%s417_s2] ss:$0 sm:$0xff] }
   0xc   :  { %v314_v9 = vld [vmem:[%s415_s0 + $0x38] sm:$0xff]   ;;  %s339_s0 = smov [#allocation2]  }
   0xd   :  { %s238_s2 = sshll.u32 %s339_s0, 4  ;;  %s239_s2 = int_to_ptr.vmem [resolvable:$true] %s238_s2 }
   0xe   :  { %s315_s6 = scalar_lea.vmem %s239_s2, 2048  ;;  %p320_p1 = scmp.lt.s32.totalorder %s239_s2, %s239_s2 }
   0xf   :  { %p316_p0 = scmp.ne.s32.totalorder %s239_s2, %s315_s6  ;;  %p321_p2 = scmp.lt.s32.totalorder %s315_s6, %s315_s6 }
  0x11   :  { %p322_p3 = por %p321_p2, %p320_p1 }
  0x12   :  { %287 = vmatmul.mubr.msk.bf16.gmra.mrb[4].mxu0 %vm95_vm0, %v313_v8  ;;  %295 = vmatmul.mubr.msk.bf16.gmra.mrb[4].mxu1 %vm95_vm0, %v314_v9 }
  0x13   :  { %p323_p4 = pnand %p322_p3, %p316_p0 }
  0xdd   :  { %v284_v11 = vpop.f32.mrb[0].mxu0  ;;  %v292_v12 = vpop.f32.mrb[0].mxu1 }
  0xde   :  { %v163_v13 = vadd.f32 %v284_v11, %v249_v10  ;;  %v195_v14 = vadd.f32 %v292_v12, %v249_v10  ;;  %v154_v15 = vpop.f32.mrb[1].mxu0  ;;  %v186_v16 = vpop.f32.mrb[1].mxu1 }
  0xdf   :  { %v155_v17 = vadd.f32 %v249_v10, %v154_v15  ;;  %v187_v18 = vadd.f32 %v249_v10, %v186_v16  ;;  %v285_v19 = vpop.f32.mrb[2].mxu0  ;;  %v293_v20 = vpop.f32.mrb[2].mxu1 }
  0xe0   :  { %219 = vst [vmem:[#allocation2 + $0x10] sm:$0xff] %v163_v13  ;;  %227 = vst [vmem:[#allocation2 + $0x50] sm:$0xff] %v195_v14  ;;  %v166_v21 = vadd.f32 %v285_v19, %v249_v10  ;;  %v198_v22 = vadd.f32 %v293_v20, %v249_v10  ;;  %v157_v23 = vpop.f32.mrb[3].mxu0  ;;  %v189_v24 = vpop.f32.mrb[3].mxu1 }
  0xe1   :  { %217 = vst [vmem:[#allocation2] sm:$0xff] %v155_v17  ;;  %225 = vst [vmem:[#allocation2 + $0x40] sm:$0xff] %v187_v18  ;;  %v158_v25 = vadd.f32 %v249_v10, %v157_v23  ;;  %v190_v26 = vadd.f32 %v249_v10, %v189_v24 }
  0xe2   :  { %220 = vst [vmem:[#allocation2 + $0x18] sm:$0xff] %v166_v21  ;;  %228 = vst [vmem:[#allocation2 + $0x58] sm:$0xff] %v198_v22 }
  0xe3   :  { %218 = vst [vmem:[#allocation2 + $0x8] sm:$0xff] %v158_v25  ;;  %226 = vst [vmem:[#allocation2 + $0x48] sm:$0xff] %v190_v26 }
  0xe5   :  { %v288_v27 = vpop.f32.mrb[4].mxu0  ;;  %v296_v28 = vpop.f32.mrb[4].mxu1 }
  0xe6   :  { %v179_v29 = vadd.f32 %v288_v27, %v249_v10  ;;  %v211_v30 = vadd.f32 %v296_v28, %v249_v10  ;;  %v170_v31 = vpop.f32.mrb[5].mxu0  ;;  %v202_v32 = vpop.f32.mrb[5].mxu1 }
  0xe7   :  { %v171_v33 = vadd.f32 %v249_v10, %v170_v31  ;;  %v203_v34 = vadd.f32 %v249_v10, %v202_v32  ;;  %v289_v35 = vpop.f32.mrb[6].mxu0  ;;  %v297_v36 = vpop.f32.mrb[6].mxu1 }
  0xe8   :  { %223 = vst [vmem:[#allocation2 + $0x30] sm:$0xff] %v179_v29  ;;  %231 = vst [vmem:[#allocation2 + $0x70] sm:$0xff] %v211_v30  ;;  %v182_v37 = vadd.f32 %v289_v35, %v249_v10  ;;  %v214_v38 = vadd.f32 %v297_v36, %v249_v10  ;;  %v173_v39 = vpop.f32.mrb[7].mxu0  ;;  %v205_v40 = vpop.f32.mrb[7].mxu1 }
  0xe9   :  { %221 = vst [vmem:[#allocation2 + $0x20] sm:$0xff] %v171_v33  ;;  %229 = vst [vmem:[#allocation2 + $0x60] sm:$0xff] %v203_v34  ;;  %v174_v41 = vadd.f32 %v249_v10, %v173_v39  ;;  %v206_v42 = vadd.f32 %v249_v10, %v205_v40 }
  0xea   :  { %224 = vst [vmem:[#allocation2 + $0x38] sm:$0xff] %v182_v37  ;;  %232 = vst [vmem:[#allocation2 + $0x78] sm:$0xff] %v214_v38 }
  0xeb   :  { %222 = vst [vmem:[#allocation2 + $0x28] sm:$0xff] %v174_v41  ;;  %230 = vst [vmem:[#allocation2 + $0x68] sm:$0xff] %v206_v42 }
  0xec   :  { %326 = shalt.err (!%p323_p4)
}
  0xed   :  { %s327_s9 = scalar_lea.hbm %s418_s3, 2048 }
  0xee   :  { %p328_p5 = scmp.ne.s32.totalorder %s418_s3, %s327_s9  ;;  %p331_p6 = scmp.lt.u32.totalorder %s327_s9, %s418_s3 }
  0xf0   :  { %p333_p7 = pnand %p331_p6, %p328_p5 }
  0xf2   :  { %336 = shalt.err (!%p333_p7)
}
  0xf3   :  { %s340_s14 = smov 128   ;;  %s341_s15 = smov 8  }
  0xf4   :  { %244 = dma.vmem_to_hbm [thread:$0]  %s239_s2, 2048, %s418_s3, [#allocation3], %s340_s14, %s340_s14, %s341_s15  }
  0xf5   :  { %337 = dma.done.wait [#allocation3], 2048  }
  0xf6   :  { %338 = vsyncadd [#allocation3], 4294965248 }
  0xf7   :  { %248 = vsyncpa [#allocation3], 1 }

</bundles_post_ra>
